<compile_context>
chip_gen: v6e
topology: v6e:2x2x1
jax: 0.10.0
libtpu: 0.0.40
codegen_flags: <defaults>
</compile_context>

<pallas_src>
import functools

import jax
import jax.numpy as jnp
from jax import lax
from jax.experimental import pallas as pl
from jax.experimental.pallas import tpu as pltpu

EPS = 1e-5
NEG_SLOPE = 0.2
LANE = 128
SUBLANE = 8
VMEM_LIMIT_BYTES = 64 * 1024 * 1024   # explicit scoped-VMEM limit (v5e/v6e/v7x safe)
VMEM_TILE_BUDGET = 36 * 1024 * 1024   # target live VMEM for pass-1 tiles (v7x headroom)


def _round_up(x, m):
    return -(-x // m) * m


# ---------------------------------------------------------------------------
# Pass 1: conv tile (im2col patches @ weights on the MXU, bf16 in / f32 acc)
#         + per-tile per-channel sum and sum-of-squares for global BatchNorm.
# ---------------------------------------------------------------------------
def _conv_stats_kernel(patches_ref, w_ref, y_ref, stats_ref):
    # patches_ref: (TM, K)       w_ref: (K, Cp)
    # y_ref:       (TM, Cp) f32  conv output tile
    # stats_ref:   (1, 8, Cp) f32 -- row 0: sum, row 1: sum of squares
    y = jnp.dot(patches_ref[...], w_ref[...], preferred_element_type=jnp.float32)
    y_ref[...] = y
    s1 = jnp.sum(y, axis=0, keepdims=True)
    s2 = jnp.sum(y * y, axis=0, keepdims=True)
    fill = jnp.zeros((6, s1.shape[1]), dtype=jnp.float32)
    stats_ref[...] = jnp.concatenate([s1, s2, fill], axis=0)[None, :, :]


# ---------------------------------------------------------------------------
# Pass 2: fused BatchNorm affine (precomputed scale/shift) + LeakyReLU(0.2).
# ---------------------------------------------------------------------------
def _bn_lrelu_kernel(y_ref, scale_ref, shift_ref, out_ref):
    z = y_ref[...] * scale_ref[...] + shift_ref[...]
    out_ref[...] = jnp.maximum(z, NEG_SLOPE * z).astype(out_ref.dtype)


def _im2col_nhwc(x_nhwc, stride):
    """3x3 patches with padding=1 -> (N*Ho*Wo, 9*Cin). Pure layout glue."""
    n, h, w, cin = x_nhwc.shape
    ho = (h + 2 - 3) // stride + 1
    wo = (w + 2 - 3) // stride + 1
    xp = jnp.pad(x_nhwc, ((0, 0), (1, 1), (1, 1), (0, 0)))
    taps = []
    for ky in range(3):
        for kx in range(3):
            t = xp[:, ky:ky + stride * (ho - 1) + 1:stride,
                     kx:kx + stride * (wo - 1) + 1:stride, :]
            taps.append(t)
    patches = jnp.concatenate(taps, axis=-1)          # (N, Ho, Wo, 9*Cin)
    return patches.reshape(n * ho * wo, 9 * cin), ho, wo


def _pick_tile_rows(m, k, cp, mm_bytes):
    """Largest M-tile (multiple of 8) whose double-buffered tiles fit the budget."""
    budget = VMEM_TILE_BUDGET - mm_bytes * k * cp            # resident weight slab
    per_row = 2 * k * mm_bytes + 2 * cp * 4 + 3 * cp * 4     # 2-buf patches + 2-buf y + temps
    tm = max(SUBLANE, min(2048, budget // per_row))
    tm = (tm // SUBLANE) * SUBLANE
    return int(min(tm, _round_up(m, SUBLANE)))


@functools.partial(jax.jit, static_argnames=("stride", "tile_rows", "use_bf16"))
def discriminator_block(x_nchw, conv_w, conv_b, bn_gamma, bn_beta, *,
                        stride, tile_rows=None, use_bf16=True):
    """Conv2d(3x3, stride, pad=1) + BatchNorm2d(batch stats) + LeakyReLU(0.2).

    x_nchw: (N, Cin, H, W); conv_w: (Cout, Cin, 3, 3) (PyTorch layouts).
    conv_b is accepted for API parity but not applied: a per-channel constant
    added before BatchNorm is cancelled exactly by the mean subtraction.
    """
    del conv_b
    n, cin, h, w = x_nchw.shape
    cout = conv_w.shape[0]
    mm_dtype = jnp.bfloat16 if use_bf16 else jnp.float32
    mm_bytes = 2 if use_bf16 else 4

    # --- JAX-side layout glue: NHWC, im2col patches in the matmul dtype. ---
    x_nhwc = jnp.transpose(x_nchw, (0, 2, 3, 1)).astype(mm_dtype)
    patches, ho, wo = _im2col_nhwc(x_nhwc, stride)    # (M, 9*Cin)
    m, k = patches.shape

    cp = _round_up(cout, LANE)                        # lane-dense channel dim
    if tile_rows is None:
        tm = _pick_tile_rows(m, k, cp, mm_bytes)
    else:
        tm = min(_round_up(max(int(tile_rows), SUBLANE), SUBLANE),
                 _round_up(m, SUBLANE))
    t = -(-m // tm)
    m_p = t * tm

    patches_p = jnp.pad(patches, ((0, m_p - m), (0, 0)))
    # Weight K index = (ky*3 + kx)*Cin + c, matching the im2col tap order.
    w2 = jnp.transpose(conv_w, (2, 3, 1, 0)).reshape(k, cout)
    w_p = jnp.pad(w2, ((0, 0), (0, cp - cout))).astype(mm_dtype)
    gamma_p = jnp.pad(bn_gamma.astype(jnp.float32), (0, cp - cout))
    beta_p = jnp.pad(bn_beta.astype(jnp.float32), (0, cp - cout))

    # --- Pass 1: conv tiles + per-tile partial BN statistics. ---
    y_flat, stats = pl.pallas_call(
        _conv_stats_kernel,
        out_shape=(
            jax.ShapeDtypeStruct((m_p, cp), jnp.float32),
            jax.ShapeDtypeStruct((t, 8, cp), jnp.float32),
        ),
        grid=(t,),
        in_specs=[
            pl.BlockSpec((tm, k), lambda i: (i, 0)),
            pl.BlockSpec((k, cp), lambda i: (0, 0)),
        ],
        out_specs=(
            pl.BlockSpec((tm, cp), lambda i: (i, 0)),
            pl.BlockSpec((1, 8, cp), lambda i: (i, 0, 0)),
        ),
        compiler_params=pltpu.CompilerParams(
            dimension_semantics=("parallel",),
            vmem_limit_bytes=VMEM_LIMIT_BYTES),
    )(patches_p, w_p)

    # --- Global training-mode BN stats, folded into per-channel scale/shift. ---
    # Zero-padded rows/channels contribute exactly 0 to the sums (no conv bias),
    # so dividing by the true element count m keeps the statistics exact.
    s1 = jnp.sum(stats[:, 0, :], axis=0)
    s2 = jnp.sum(stats[:, 1, :], axis=0)
    mean = s1 / m
    var = jnp.maximum(s2 / m - mean * mean, 0.0)
    inv_std = lax.rsqrt(var + EPS)
    scale = (gamma_p * inv_std).reshape(1, cp)
    shift = (beta_p - mean * gamma_p * inv_std).reshape(1, cp)

    # --- Pass 2: elementwise BN affine + LeakyReLU, lane-dense tiles. ---
    out_flat = pl.pallas_call(
        _bn_lrelu_kernel,
        out_shape=jax.ShapeDtypeStruct((m_p, cp), x_nchw.dtype),
        grid=(t,),
        in_specs=[
            pl.BlockSpec((tm, cp), lambda i: (i, 0)),
            pl.BlockSpec((1, cp), lambda i: (0, 0)),
            pl.BlockSpec((1, cp), lambda i: (0, 0)),
        ],
        out_specs=pl.BlockSpec((tm, cp), lambda i: (i, 0)),
        compiler_params=pltpu.CompilerParams(
            dimension_semantics=("parallel",),
            vmem_limit_bytes=VMEM_LIMIT_BYTES),
    )(y_flat, scale, shift)

    out = out_flat[:m, :cout].reshape(n, ho, wo, cout)
    return jnp.transpose(out, (0, 3, 1, 2))           # back to NCHW


def _reference(x_nchw, conv_w, conv_b, bn_gamma, bn_beta, stride):
    """Plain-JAX f32 reference mirroring the PyTorch forward (BN training mode)."""
    y = lax.conv_general_dilated(
        x_nchw, conv_w, window_strides=(stride, stride),
        padding=((1, 1), (1, 1)),
        dimension_numbers=("NCHW", "OIHW", "NCHW"))
    y = y + conv_b.reshape(1, -1, 1, 1)
    mean = jnp.mean(y, axis=(0, 2, 3), keepdims=True)
    var = jnp.mean((y - mean) ** 2, axis=(0, 2, 3), keepdims=True)
    y_hat = (y - mean) * lax.rsqrt(var + EPS)
    z = y_hat * bn_gamma.reshape(1, -1, 1, 1) + bn_beta.reshape(1, -1, 1, 1)
    return jnp.where(z >= 0, z, NEG_SLOPE * z)


if __name__ == "__main__":
    key = jax.random.PRNGKey(0)
    k_x, k_w, k_b, k_g, k_be = jax.random.split(key, 5)

    N, C_IN, C_OUT, H, W = 2, 4, 8, 16, 16

    x = jax.random.normal(k_x, (N, C_IN, H, W), dtype=jnp.float32)
    conv_w = jax.random.normal(k_w, (C_OUT, C_IN, 3, 3), dtype=jnp.float32) * 0.1
    conv_b = jax.random.normal(k_b, (C_OUT,), dtype=jnp.float32) * 0.1
    bn_gamma = 1.0 + 0.1 * jax.random.normal(k_g, (C_OUT,), dtype=jnp.float32)
    bn_beta = 0.1 * jax.random.normal(k_be, (C_OUT,), dtype=jnp.float32)

    # (stride, tile_rows, use_bf16, atol/rtol):
    #  - default path (auto tile size, bf16 MXU inputs)
    #  - multi-tile path with M-padding + exact f32 matmul (tight tolerance proves
    #    the tiled, cross-tile BatchNorm statistics are exact)
    #  - stride-1 multi-tile bf16 path
    cases = (
        dict(stride=2, tile_rows=None, use_bf16=True,  atol=5e-2, rtol=5e-2),
        dict(stride=2, tile_rows=48,   use_bf16=False, atol=1e-4, rtol=1e-4),
        dict(stride=1, tile_rows=64,   use_bf16=True,  atol=5e-2, rtol=5e-2),
    )
    for c in cases:
        out = discriminator_block(x, conv_w, conv_b, bn_gamma, bn_beta,
                                  stride=c["stride"], tile_rows=c["tile_rows"],
                                  use_bf16=c["use_bf16"])
        out = jax.block_until_ready(out)
        ref = _reference(x, conv_w, conv_b, bn_gamma, bn_beta, c["stride"])
        assert out.shape == ref.shape == (N, C_OUT, H // c["stride"], W // c["stride"])
        assert jnp.allclose(out, ref, atol=c["atol"], rtol=c["rtol"]), (
            c, float(jnp.max(jnp.abs(out - ref))))

    print("KERNEL_OK")
</pallas_src>

<mosaic_0001>
module attributes {stable_mosaic.version = 11 : i64} {
  func.func @_conv_stats_kernel(%arg0: i32, %arg1: memref<128x36xbf16, #tpu.memory_space<vmem>>, %arg2: memref<36x128xbf16, #tpu.memory_space<vmem>>, %arg3: memref<128x128xf32, #tpu.memory_space<vmem>>, %arg4: memref<1x8x128xf32, #tpu.memory_space<vmem>>) attributes {dimension_semantics = [#tpu.dimension_semantics<parallel>], iteration_bounds = array<i64: 1>, scalar_prefetch = 0 : i64, scratch_operands = 0 : i64, tpu.core_type = #tpu.core_type<tc>, window_params = [{transform_indices = @transform_0, window_bounds = array<i64: 128, 36>}, {pipeline_mode = #tpu.pipeline_mode<synchronous>, transform_indices = @transform_1, window_bounds = array<i64: 36, 128>}, {transform_indices = @transform_2, window_bounds = array<i64: 128, 128>}, {transform_indices = @transform_3, window_bounds = array<i64: 1, 8, 128>}]} {
    %c0 = arith.constant 0 : index
    %c0_0 = arith.constant 0 : index
    %0 = vector.load %arg1[%c0, %c0_0] : memref<128x36xbf16, #tpu.memory_space<vmem>>, vector<128x36xbf16>
    %c0_1 = arith.constant 0 : index
    %c0_2 = arith.constant 0 : index
    %1 = vector.load %arg2[%c0_1, %c0_2] : memref<36x128xbf16, #tpu.memory_space<vmem>>, vector<36x128xbf16>
    %cst = arith.constant dense<0.000000e+00> : vector<128x128xf32>
    %2 = tpu.matmul %0, %1, %cst {dimension_numbers = #tpu.dot_dimension_numbers<[1], [0], [0], [1], [0, 0, 1, 1], [], []>} : vector<128x36xbf16>, vector<36x128xbf16>, vector<128x128xf32> -> vector<128x128xf32>
    %c0_3 = arith.constant 0 : index
    %c0_4 = arith.constant 0 : index
    %3 = vector.load %arg3[%c0_3, %c0_4] : memref<128x128xf32, #tpu.memory_space<vmem>>, vector<128x128xf32>
    tpu.vector_store %arg3[%c0_3, %c0_4], %2 {strides = array<i32>} : memref<128x128xf32, #tpu.memory_space<vmem>>, vector<128x128xf32>,
    %cst_5 = arith.constant dense<0.000000e+00> : vector<128xf32>
    %4 = vector.multi_reduction <add>, %2, %cst_5 [0] : vector<128x128xf32> to vector<128xf32>
    %5 = vector.shape_cast %4 : vector<128xf32> to vector<1x128xf32>
    %6 = arith.mulf %2, %2 : vector<128x128xf32>
    %cst_6 = arith.constant dense<0.000000e+00> : vector<128xf32>
    %7 = vector.multi_reduction <add>, %6, %cst_6 [0] : vector<128x128xf32> to vector<128xf32>
    %8 = vector.shape_cast %7 : vector<128xf32> to vector<1x128xf32>
    %cst_7 = arith.constant 0.000000e+00 : f32
    %9 = vector.broadcast %cst_7 : f32 to vector<6x128xf32>
    %10 = tpu.concatenate %5, %8, %9 in 0 : vector<1x128xf32>, vector<1x128xf32>, vector<6x128xf32> -> vector<8x128xf32>
    %11 = vector.shape_cast %10 : vector<8x128xf32> to vector<1x8x128xf32>
    %c0_8 = arith.constant 0 : index
    %c0_9 = arith.constant 0 : index
    %c0_10 = arith.constant 0 : index
    %12 = vector.load %arg4[%c0_8, %c0_9, %c0_10] : memref<1x8x128xf32, #tpu.memory_space<vmem>>, vector<1x8x128xf32>
    tpu.vector_store %arg4[%c0_8, %c0_9, %c0_10], %11 {strides = array<i32>} : memref<1x8x128xf32, #tpu.memory_space<vmem>>, vector<1x8x128xf32>,
    return
  }
  func.func @transform_0(%arg0: i32) -> (i32, i32) {
    %c0_i32 = arith.constant 0 : i32
    %c0_i32_0 = arith.constant 0 : i32
    return %arg0, %c0_i32 : i32, i32
  }
  func.func @transform_1(%arg0: i32) -> (i32, i32) {
    %c0_i32 = arith.constant 0 : i32
    %c0_i32_0 = arith.constant 0 : i32
    %c0_i32_1 = arith.constant 0 : i32
    return %c0_i32, %c0_i32_0 : i32, i32
  }
  func.func @transform_2(%arg0: i32) -> (i32, i32) {
    %c0_i32 = arith.constant 0 : i32
    %c0_i32_0 = arith.constant 0 : i32
    return %arg0, %c0_i32 : i32, i32
  }
  func.func @transform_3(%arg0: i32) -> (i32, i32, i32) {
    %c0_i32 = arith.constant 0 : i32
    %c0_i32_0 = arith.constant 0 : i32
    %c0_i32_1 = arith.constant 0 : i32
    return %arg0, %c0_i32, %c0_i32_0 : i32, i32, i32
  }
}

module attributes {stable_mosaic.version = 11 : i64} {
  func.func @_bn_lrelu_kernel(%arg0: i32, %arg1: memref<128x128xf32, #tpu.memory_space<vmem>>, %arg2: memref<1x128xf32, #tpu.memory_space<vmem>>, %arg3: memref<1x128xf32, #tpu.memory_space<vmem>>, %arg4: memref<128x128xf32, #tpu.memory_space<vmem>>) attributes {dimension_semantics = [#tpu.dimension_semantics<parallel>], iteration_bounds = array<i64: 1>, scalar_prefetch = 0 : i64, scratch_operands = 0 : i64, tpu.core_type = #tpu.core_type<tc>, window_params = [{transform_indices = @transform_0, window_bounds = array<i64: 128, 128>}, {pipeline_mode = #tpu.pipeline_mode<synchronous>, transform_indices = @transform_1, window_bounds = array<i64: 1, 128>}, {pipeline_mode = #tpu.pipeline_mode<synchronous>, transform_indices = @transform_2, window_bounds = array<i64: 1, 128>}, {transform_indices = @transform_3, window_bounds = array<i64: 128, 128>}]} {
    %c0 = arith.constant 0 : index
    %c0_0 = arith.constant 0 : index
    %0 = vector.load %arg1[%c0, %c0_0] : memref<128x128xf32, #tpu.memory_space<vmem>>, vector<128x128xf32>
    %c0_1 = arith.constant 0 : index
    %c0_2 = arith.constant 0 : index
    %1 = vector.load %arg2[%c0_1, %c0_2] : memref<1x128xf32, #tpu.memory_space<vmem>>, vector<1x128xf32>
    %2 = vector.broadcast %1 : vector<1x128xf32> to vector<128x128xf32>
    %3 = arith.mulf %0, %2 : vector<128x128xf32>
    %c0_3 = arith.constant 0 : index
    %c0_4 = arith.constant 0 : index
    %4 = vector.load %arg3[%c0_3, %c0_4] : memref<1x128xf32, #tpu.memory_space<vmem>>, vector<1x128xf32>
    %5 = vector.broadcast %4 : vector<1x128xf32> to vector<128x128xf32>
    %6 = arith.addf %3, %5 : vector<128x128xf32>
    %cst = arith.constant 2.000000e-01 : f32
    %7 = vector.broadcast %cst : f32 to vector<128x128xf32>
    %8 = arith.mulf %7, %6 : vector<128x128xf32>
    %9 = arith.maximumf %6, %8 : vector<128x128xf32>
    %c0_5 = arith.constant 0 : index
    %c0_6 = arith.constant 0 : index
    %10 = vector.load %arg4[%c0_5, %c0_6] : memref<128x128xf32, #tpu.memory_space<vmem>>, vector<128x128xf32>
    tpu.vector_store %arg4[%c0_5, %c0_6], %9 {strides = array<i32>} : memref<128x128xf32, #tpu.memory_space<vmem>>, vector<128x128xf32>,
    return
  }
  func.func @transform_0(%arg0: i32) -> (i32, i32) {
    %c0_i32 = arith.constant 0 : i32
    %c0_i32_0 = arith.constant 0 : i32
    return %arg0, %c0_i32 : i32, i32
  }
  func.func @transform_1(%arg0: i32) -> (i32, i32) {
    %c0_i32 = arith.constant 0 : i32
    %c0_i32_0 = arith.constant 0 : i32
    %c0_i32_1 = arith.constant 0 : i32
    return %c0_i32, %c0_i32_0 : i32, i32
  }
  func.func @transform_2(%arg0: i32) -> (i32, i32) {
    %c0_i32 = arith.constant 0 : i32
    %c0_i32_0 = arith.constant 0 : i32
    %c0_i32_1 = arith.constant 0 : i32
    return %c0_i32, %c0_i32_0 : i32, i32
  }
  func.func @transform_3(%arg0: i32) -> (i32, i32) {
    %c0_i32 = arith.constant 0 : i32
    %c0_i32_0 = arith.constant 0 : i32
    return %arg0, %c0_i32 : i32, i32
  }
}

</mosaic_0001>

<bundles_post_ra>
// kernel: discriminator_block.3
= control target key start
LH: loop header
LB: loop body
LE: loop exit
PB: predicated region body
PF: predicated region fallthrough
CT: control target
= control target key end

     0   :  { %s288_s0 = inlined_call_operand.vmem [shape: f32[128,128], index: 0, kind: input, shape index: {}]   ;;  %s289_s1 = inlined_call_operand.vmem [shape: f32[1,128], index: 1, kind: input, shape index: {}]   ;;  %s290_s2 = inlined_call_operand.vmem [shape: f32[1,128], index: 2, kind: input, shape index: {}]   ;;  %s291_s3 = inlined_call_operand.vmem [shape: f32[128,128], index: 3, kind: output, shape index: {}]  }
   0x1   :  { %v14_v0 = vld [vmem:[%s288_s0] sm:$0xff]  ;;  %v15_v4 = vld [vmem:[%s288_s0 + $0x8] sm:$0xff]  ;;  %v16_v5 = vld [vmem:[%s288_s0 + $0x10] sm:$0xff] }
   0x2   :  { %v156_v1 = vld [vmem:[%s289_s1] ss:$0 sm:$0xff]  ;;  %v17_v6 = vld [vmem:[%s288_s0 + $0x18] sm:$0xff]  ;;  %v19_v11 = vld [vmem:[%s288_s0 + $0x28] sm:$0xff] }
   0x3   :  { %v161_v2 = vld [vmem:[%s290_s2] ss:$0 sm:$0xff]  ;;  %v37_v3 = vmul.f32 %v156_v1, %v14_v0  ;;  %v38_v7 = vmul.f32 %v156_v1, %v15_v4  ;;  %v39_v8 = vmul.f32 %v156_v1, %v16_v5  ;;  %v40_v9 = vmul.f32 %v156_v1, %v17_v6  ;;  %v20_v12 = vld [vmem:[%s288_s0 + $0x30] sm:$0xff]  ;;  %v21_v17 = vld [vmem:[%s288_s0 + $0x38] sm:$0xff] }
   0x4   :  { %v18_v10 = vld [vmem:[%s288_s0 + $0x20] sm:$0xff]  ;;  %v42_v15 = vmul.f32 %v156_v1, %v19_v11  ;;  %v43_v16 = vmul.f32 %v156_v1, %v20_v12  ;;  %v44_v21 = vmul.f32 %v156_v1, %v21_v17  ;;  %v23_v27 = vld [vmem:[%s288_s0 + $0x48] sm:$0xff]  ;;  %v24_v28 = vld [vmem:[%s288_s0 + $0x50] sm:$0xff] }
   0x5   :  { %v60_v13 = vadd.f32 %v161_v2, %v37_v3  ;;  %v41_v14 = vmul.f32 %v156_v1, %v18_v10  ;;  %v61_v18 = vadd.f32 %v161_v2, %v38_v7  ;;  %v62_v19 = vadd.f32 %v161_v2, %v39_v8  ;;  %v22_v22 = vld [vmem:[%s288_s0 + $0x40] sm:$0xff]  ;;  %v25_v29 = vld [vmem:[%s288_s0 + $0x58] sm:$0xff]  ;;  %v27_v43 = vld [vmem:[%s288_s0 + $0x68] sm:$0xff] }
   0x6   :  { %v63_v20 = vadd.f32 %v161_v2, %v40_v9  ;;  %v65_v25 = vadd.f32 %v161_v2, %v42_v15  ;;  %v66_v26 = vadd.f32 %v161_v2, %v43_v16  ;;  %v67_v33 = vadd.f32 %v161_v2, %v44_v21  ;;  %v26_v42 = vld [vmem:[%s288_s0 + $0x60] sm:$0xff]  ;;  %v28_v44 = vld [vmem:[%s288_s0 + $0x70] sm:$0xff]  ;;  %v29_v49 = vld [vmem:[%s288_s0 + $0x78] sm:$0xff] }
   0x7   :  { %v76_v23 = vmul.f32 0.2, %v60_v13  ;;  %v64_v24 = vadd.f32 %v161_v2, %v41_v14  ;;  %v77_v30 = vmul.f32 0.2, %v61_v18  ;;  %v78_v31 = vmul.f32 0.2, %v62_v19 }
   0x8   :  { %v79_v32 = vmul.f32 0.2, %v63_v20  ;;  %v81_v36 = vmul.f32 0.2, %v65_v25  ;;  %v82_v37 = vmul.f32 0.2, %v66_v26  ;;  %v45_v48 = vmul.f32 %v156_v1, %v22_v22 }
   0x9   :  { %v92_v34 = vmax.f32 %v60_v13, %v76_v23  ;;  %v80_v35 = vmul.f32 0.2, %v64_v24  ;;  %v93_v38 = vmax.f32 %v61_v18, %v77_v30  ;;  %v94_v39 = vmax.f32 %v62_v19, %v78_v31 }
   0xa   :  { %v95_v40 = vmax.f32 %v63_v20, %v79_v32  ;;  %v83_v41 = vmul.f32 0.2, %v67_v33  ;;  %v97_v46 = vmax.f32 %v65_v25, %v81_v36  ;;  %v98_v47 = vmax.f32 %v66_v26, %v82_v37 }
   0xb   :  { %108 = vst [vmem:[%s291_s3] sm:$0xff] %v92_v34  ;;  %v96_v45 = vmax.f32 %v64_v24, %v80_v35  ;;  %109 = vst [vmem:[%s291_s3 + $0x8] sm:$0xff] %v93_v38  ;;  %v46_v51 = vmul.f32 %v156_v1, %v23_v27  ;;  %v47_v52 = vmul.f32 %v156_v1, %v24_v28 }
   0xc   :  { %110 = vst [vmem:[%s291_s3 + $0x10] sm:$0xff] %v94_v39  ;;  %111 = vst [vmem:[%s291_s3 + $0x18] sm:$0xff] %v95_v40  ;;  %v99_v50 = vmax.f32 %v67_v33, %v83_v41  ;;  %v48_v53 = vmul.f32 %v156_v1, %v25_v29  ;;  %v68_v54 = vadd.f32 %v161_v2, %v45_v48 }
   0xd   :  { %112 = vst [vmem:[%s291_s3 + $0x20] sm:$0xff] %v96_v45  ;;  %113 = vst [vmem:[%s291_s3 + $0x28] sm:$0xff] %v97_v46  ;;  %v49_v55 = vmul.f32 %v156_v1, %v26_v42  ;;  %v50_v56 = vmul.f32 %v156_v1, %v27_v43  ;;  %v51_v57 = vmul.f32 %v156_v1, %v28_v44 }
   0xe   :  { %114 = vst [vmem:[%s291_s3 + $0x30] sm:$0xff] %v98_v47  ;;  %115 = vst [vmem:[%s291_s3 + $0x38] sm:$0xff] %v99_v50  ;;  %v69_v58 = vadd.f32 %v161_v2, %v46_v51  ;;  %v70_v59 = vadd.f32 %v161_v2, %v47_v52  ;;  %v71_v60 = vadd.f32 %v161_v2, %v48_v53  ;;  %v84_v62 = vmul.f32 0.2, %v68_v54 }
   0xf   :  { %v52_v61 = vmul.f32 %v156_v1, %v29_v49  ;;  %v72_v63 = vadd.f32 %v161_v2, %v49_v55  ;;  %v73_v0 = vadd.f32 %v161_v2, %v50_v56  ;;  %v74_v3 = vadd.f32 %v161_v2, %v51_v57 }
  0x10   :  { %v85_v4 = vmul.f32 0.2, %v69_v58  ;;  %v86_v5 = vmul.f32 0.2, %v70_v59  ;;  %v87_v6 = vmul.f32 0.2, %v71_v60  ;;  %v100_v8 = vmax.f32 %v68_v54, %v84_v62 }
  0x11   :  { %v75_v7 = vadd.f32 %v161_v2, %v52_v61  ;;  %v88_v9 = vmul.f32 0.2, %v72_v63  ;;  %v89_v10 = vmul.f32 0.2, %v73_v0  ;;  %v90_v11 = vmul.f32 0.2, %v74_v3 }
  0x12   :  { %v101_v12 = vmax.f32 %v69_v58, %v85_v4  ;;  %v102_v13 = vmax.f32 %v70_v59, %v86_v5  ;;  %v103_v14 = vmax.f32 %v71_v60, %v87_v6  ;;  %116 = vst [vmem:[%s291_s3 + $0x40] sm:$0xff] %v100_v8 }
  0x13   :  { %v91_v1 = vmul.f32 0.2, %v75_v7  ;;  %v104_v15 = vmax.f32 %v72_v63, %v88_v9  ;;  %v105_v16 = vmax.f32 %v73_v0, %v89_v10  ;;  %v106_v17 = vmax.f32 %v74_v3, %v90_v11 }
  0x14   :  { %117 = vst [vmem:[%s291_s3 + $0x48] sm:$0xff] %v101_v12  ;;  %118 = vst [vmem:[%s291_s3 + $0x50] sm:$0xff] %v102_v13 }
  0x15   :  { %119 = vst [vmem:[%s291_s3 + $0x58] sm:$0xff] %v103_v14  ;;  %v107_v2 = vmax.f32 %v75_v7, %v91_v1  ;;  %120 = vst [vmem:[%s291_s3 + $0x60] sm:$0xff] %v104_v15 }
  0x16   :  { %121 = vst [vmem:[%s291_s3 + $0x68] sm:$0xff] %v105_v16  ;;  %122 = vst [vmem:[%s291_s3 + $0x70] sm:$0xff] %v106_v17 }
  0x17   :  { %123 = vst [vmem:[%s291_s3 + $0x78] sm:$0xff] %v107_v2 }

// kernel: discriminator_block.2
= control target key start
LH: loop header
LB: loop body
LE: loop exit
PB: predicated region body
PF: predicated region fallthrough
CT: control target
= control target key end

     0   :  { %vm115_vm0 = vcmask 1041408   ;;  %vm90_vm1 = vcmask 293888   ;;  %vm290_vm2 = vcmask 1040384   ;;  %s489_s1 = inlined_call_operand.vmem [shape: bf16[36,128], index: 1, kind: input, shape index: {}]   ;;  %s490_s0 = inlined_call_operand.vmem [shape: bf16[128,36], index: 0, kind: input, shape index: {}]   ;;  %s491_s2 = inlined_call_operand.vmem [shape: f32[128,128], index: 2, kind: output, shape index: {0}]   ;;  %s492_s3 = inlined_call_operand.vmem [shape: f32[1,8,128], index: 3, kind: output, shape index: {1}]  }
   0x1   :  { %v362_v0 = vld [vmem:[%s489_s1 + $0x10] ss:$0 sps:$4 sm:$0x33]   ;;  %v363_v1 = vld [vmem:[%s489_s1 + $0x8] sm:$0xff]   ;;  %v365_v3 = vld [vmem:[%s490_s0] sm:$0xff]  }
   0x2   :  { %360 = vmatprep.subr.msk.bf16.mxu0 %vm115_vm0, %v362_v0  ;;  %v117_v2 = vsel %vm115_vm0, %v362_v0, 0  ;;  %361 = vmatprep.subr.msk.bf16.mxu1 %vm115_vm0, %v362_v0  ;;  %v364_v4 = vld [vmem:[%s489_s1] sm:$0xff]   ;;  %v366_v6 = vld [vmem:[%s490_s0 + $0x8] sm:$0xff]   ;;  %v367_v8 = vld [vmem:[%s490_s0 + $0x10] sm:$0xff]  }
   0x3   :  { %333 = vmatpush3.bf16.msra.mxu0 %v117_v2  ;;  %357 = vmatpush3.bf16.msra.mxu1 %v117_v2  ;;  %v369_v5 = vld [vmem:[%s490_s0 + $0x20] sm:$0xff]   ;;  %v370_v7 = vld [vmem:[%s490_s0 + $0x28] sm:$0xff]   ;;  %v371_v9 = vld [vmem:[%s490_s0 + $0x30] sm:$0xff]  }
   0x4   :  { %334 = vmatprep.subr.bf16.mxu0 %v363_v1  ;;  %355 = vmatprep.subr.bf16.mxu1 %v363_v1  ;;  %v368_v10 = vld [vmem:[%s490_s0 + $0x18] sm:$0xff]  }
   0x5   :  { %338 = vmatprep.mubr.msk.bf16.mxu0 %vm90_vm1, %v365_v3  ;;  %346 = vmatprep.mubr.msk.bf16.mxu1 %vm90_vm1, %v369_v5  ;;  %v372_v11 = vld [vmem:[%s490_s0 + $0x38] sm:$0xff]  }
   0x7   :  { %335 = vmatpush3.bf16.msra.mxu0 %v363_v1  ;;  %358 = vmatpush3.bf16.msra.mxu1 %v363_v1 }
   0x8   :  { %336 = vmatprep.subr.bf16.mxu0 %v364_v4  ;;  %356 = vmatprep.subr.bf16.mxu1 %v364_v4 }
   0xb   :  { %337 = vmatpush3.bf16.msra.mxu0 %v364_v4  ;;  %359 = vmatpush3.bf16.msra.mxu1 %v364_v4 }
   0xe   :  { %339 = vmatmul.mubr.msk.bf16.vlgmr.msra.gmra.mxu0 %vm90_vm1, %v366_v6  ;;  %347 = vmatmul.mubr.msk.bf16.vlgmr.msra.gmra.mxu1 %vm90_vm1, %v370_v7 }
   0xf   :  { %342 = vmatprep.mubr.msk.bf16.mxu0 %vm90_vm1, %v367_v8  ;;  %350 = vmatprep.mubr.msk.bf16.mxu1 %vm90_vm1, %v371_v9 }
  0x16   :  { %343 = vmatmul.mubr.msk.bf16.gmra.mxu0 %vm90_vm1, %v368_v10  ;;  %351 = vmatmul.mubr.msk.bf16.gmra.mxu1 %vm90_vm1, %v372_v11 }
  0xce   :  { %v340_v12 = vpop.f32.mrf.mxu0  ;;  %v348_v13 = vpop.f32.mrf.mxu1 }
  0xcf   :  { %218 = vst [vmem:[%s491_s2 + $0x10] sm:$0xff] %v340_v12  ;;  %226 = vst [vmem:[%s491_s2 + $0x50] sm:$0xff] %v348_v13  ;;  %v255_v25 = vmul.f32 %v340_v12, %v340_v12  ;;  %v263_v55 = vmul.f32 %v348_v13, %v348_v13 }
  0xd0   :  { %v153_v14 = vpop.f32.mrf.mxu0  ;;  %v185_v15 = vpop.f32.mrf.mxu1 }
  0xd1   :  { %216 = vst [vmem:[%s491_s2] sm:$0xff] %v153_v14  ;;  %224 = vst [vmem:[%s491_s2 + $0x40] sm:$0xff] %v185_v15  ;;  %v253_v20 = vmul.f32 %v153_v14, %v153_v14  ;;  %v261_v49 = vmul.f32 %v185_v15, %v185_v15 }
  0xd2   :  { %v341_v16 = vpop.f32.mrf.mxu0  ;;  %v349_v17 = vpop.f32.mrf.mxu1 }
  0xd3   :  { %219 = vst [vmem:[%s491_s2 + $0x18] sm:$0xff] %v341_v16  ;;  %227 = vst [vmem:[%s491_s2 + $0x58] sm:$0xff] %v349_v17  ;;  %v256_v30 = vmul.f32 %v341_v16, %v341_v16  ;;  %v264_v58 = vmul.f32 %v349_v17, %v349_v17 }
  0xd4   :  { %v156_v18 = vpop.f32.mrf.mxu0  ;;  %v188_v19 = vpop.f32.mrf.mxu1 }
  0xd5   :  { %217 = vst [vmem:[%s491_s2 + $0x8] sm:$0xff] %v156_v18  ;;  %v232_v21 = vadd.f32 %v156_v18, %v153_v14  ;;  %v254_v22 = vmul.f32 %v156_v18, %v156_v18  ;;  %225 = vst [vmem:[%s491_s2 + $0x48] sm:$0xff] %v188_v19  ;;  %v262_v53 = vmul.f32 %v188_v19, %v188_v19 }
  0xd6   :  { %v344_v23 = vpop.f32.mrf.mxu0  ;;  %v352_v24 = vpop.f32.mrf.mxu1 }
  0xd7   :  { %v233_v26 = vadd.f32 %v340_v12, %v232_v21  ;;  %v269_v27 = vadd.f32 %v254_v22, %v253_v20  ;;  %222 = vst [vmem:[%s491_s2 + $0x30] sm:$0xff] %v344_v23  ;;  %230 = vst [vmem:[%s491_s2 + $0x70] sm:$0xff] %v352_v24  ;;  %v259_v43 = vmul.f32 %v344_v23, %v344_v23 }
  0xd8   :  { %v169_v28 = vpop.f32.mrf.mxu0  ;;  %v201_v29 = vpop.f32.mrf.mxu1  ;;  %v267_v3 = vmul.f32 %v352_v24, %v352_v24 }
  0xd9   :  { %v270_v31 = vadd.f32 %v269_v27, %v255_v25  ;;  %220 = vst [vmem:[%s491_s2 + $0x20] sm:$0xff] %v169_v28  ;;  %v234_v32 = vadd.f32 %v341_v16, %v233_v26  ;;  %228 = vst [vmem:[%s491_s2 + $0x60] sm:$0xff] %v201_v29  ;;  %v257_v36 = vmul.f32 %v169_v28, %v169_v28 }
  0xda   :  { %v345_v33 = vpop.f32.mrf.mxu0  ;;  %v353_v34 = vpop.f32.mrf.mxu1  ;;  %v265_v62 = vmul.f32 %v201_v29, %v201_v29 }
  0xdb   :  { %v235_v35 = vadd.f32 %v234_v32, %v169_v28  ;;  %v271_v37 = vadd.f32 %v270_v31, %v256_v30  ;;  %223 = vst [vmem:[%s491_s2 + $0x38] sm:$0xff] %v345_v33  ;;  %231 = vst [vmem:[%s491_s2 + $0x78] sm:$0xff] %v353_v34  ;;  %v260_v46 = vmul.f32 %v345_v33, %v345_v33 }
  0xdc   :  { %v172_v38 = vpop.f32.mrf.mxu0  ;;  %v204_v39 = vpop.f32.mrf.mxu1  ;;  %v268_v6 = vmul.f32 %v353_v34, %v353_v34 }
  0xdd   :  { %v272_v40 = vadd.f32 %v271_v37, %v257_v36  ;;  %221 = vst [vmem:[%s491_s2 + $0x28] sm:$0xff] %v172_v38  ;;  %v236_v41 = vadd.f32 %v235_v35, %v172_v38  ;;  %v258_v42 = vmul.f32 %v172_v38, %v172_v38  ;;  %229 = vst [vmem:[%s491_s2 + $0x68] sm:$0xff] %v204_v39 }
  0xde   :  { %v266_v2 = vmul.f32 %v204_v39, %v204_v39 }
  0xdf   :  { %v237_v44 = vadd.f32 %v344_v23, %v236_v41  ;;  %v273_v45 = vadd.f32 %v272_v40, %v258_v42 }
  0xe1   :  { %v238_v47 = vadd.f32 %v345_v33, %v237_v44  ;;  %v274_v48 = vadd.f32 %v273_v45, %v259_v43 }
  0xe3   :  { %v275_v50 = vadd.f32 %v274_v48, %v260_v46  ;;  %v239_v51 = vadd.f32 %v238_v47, %v185_v15 }
  0xe5   :  { %v240_v52 = vadd.f32 %v239_v51, %v188_v19  ;;  %v276_v54 = vadd.f32 %v275_v50, %v261_v49 }
  0xe7   :  { %v241_v56 = vadd.f32 %v348_v13, %v240_v52  ;;  %v277_v57 = vadd.f32 %v276_v54, %v262_v53 }
  0xe9   :  { %v278_v59 = vadd.f32 %v277_v57, %v263_v55  ;;  %v242_v60 = vadd.f32 %v349_v17, %v241_v56 }
  0xeb   :  { %v243_v61 = vadd.f32 %v242_v60, %v201_v29  ;;  %v279_v63 = vadd.f32 %v278_v59, %v264_v58 }
  0xed   :  { %v280_v0 = vadd.f32 %v279_v63, %v265_v62  ;;  %v244_v1 = vadd.f32 %v243_v61, %v204_v39 }
  0xef   :  { %v245_v4 = vadd.f32 %v352_v24, %v244_v1  ;;  %v281_v5 = vadd.f32 %v280_v0, %v266_v2 }
  0xf1   :  { %v246_v7 = vadd.f32 %v353_v34, %v245_v4  ;;  %v282_v8 = vadd.f32 %v281_v5, %v267_v3 }
  0xf3   :  { %v247_v9 = vrot.slane %v246_v7, 4  ;;  %v283_v10 = vadd.f32 %v282_v8, %v268_v6 }
  0xf5   :  { %v248_v11 = vadd.f32 %v247_v9, %v246_v7  ;;  %v284_v12 = vrot.slane %v283_v10, 4 }
  0xf7   :  { %v249_v13 = vrot.slane %v248_v11, 2  ;;  %v285_v14 = vadd.f32 %v284_v12, %v283_v10 }
  0xf9   :  { %v250_v15 = vadd.f32 %v249_v13, %v248_v11  ;;  %v286_v16 = vrot.slane %v285_v14, 2 }
  0xfb   :  { %v251_v17 = vrot.slane %v250_v15, 1  ;;  %v287_v18 = vadd.f32 %v286_v16, %v285_v14 }
  0xfd   :  { %v288_v19 = vrot.slane %v287_v18, 1  ;;  %v252_v20 = vadd.f32 %v251_v17, %v250_v15 }
  0xff   :  { %v289_v21 = vadd.f32 %v288_v19, %v287_v18 }
 0x101   :  { %v291_v22 = vsel %vm290_vm2, %v252_v20, %v289_v21 }
 0x102   :  { %v292_v23 = vsel %vm115_vm0, %v291_v22, 0.0 }
 0x103   :  { %293 = vst [vmem:[%s492_s3] sm:$0xff] %v292_v23 }

</bundles_post_ra>
